<compile_context>
chip_gen: v6e
topology: v6e:2x2x1
jax: 0.10.0
libtpu: 0.0.40
codegen_flags: <defaults>
</compile_context>

<pallas_src>
import functools

import jax
import jax.numpy as jnp
from jax.experimental import pallas as pl
from jax.experimental.pallas import tpu as pltpu


# --------------------------------------------------------------------------
# Kernels
# --------------------------------------------------------------------------
def _ffn_kernel(x_ref, w1_ref, w2_ref, o_ref, acc_ref):
    # x_ref: (tn, D)  w1_ref: (D, tf)  w2_ref: (tf, D)  o_ref/acc_ref: (tn, D)
    f = pl.program_id(1)

    @pl.when(f == 0)
    def _init():
        acc_ref[...] = jnp.zeros_like(acc_ref)

    h = jnp.dot(x_ref[...], w1_ref[...], preferred_element_type=jnp.float32)
    h = jnp.maximum(h, 0.0)
    h = h * h  # relu_square
    # Cast to weight dtype for the second MXU pass.  Exact for f32 weights;
    # for bf16 it rounds the activation (documented, small tolerance).
    acc_ref[...] += jnp.dot(h.astype(w2_ref.dtype), w2_ref[...],
                            preferred_element_type=jnp.float32)

    @pl.when(f == pl.num_programs(1) - 1)
    def _store():
        o_ref[...] = acc_ref[...].astype(o_ref.dtype)


def _ffn_gated_kernel(x_ref, w1g_ref, w2_ref, o_ref, acc_ref, *, tile_f):
    # w1g_ref: (D, 2*tf) holding the interleaved slice [W1_f | Wg_f].
    f = pl.program_id(1)

    @pl.when(f == 0)
    def _init():
        acc_ref[...] = jnp.zeros_like(acc_ref)

    # Single fused matmul against [W1_f | Wg_f], then split halves.
    hg = jnp.dot(x_ref[...], w1g_ref[...], preferred_element_type=jnp.float32)
    h = hg[:, :tile_f] * hg[:, tile_f:]   # to_hidden(x) * gate(x)
    h = jnp.maximum(h, 0.0)
    h = h * h                              # relu_square
    acc_ref[...] += jnp.dot(h.astype(w2_ref.dtype), w2_ref[...],
                            preferred_element_type=jnp.float32)

    @pl.when(f == pl.num_programs(1) - 1)
    def _store():
        o_ref[...] = acc_ref[...].astype(o_ref.dtype)


# --------------------------------------------------------------------------
# Wrapper
# --------------------------------------------------------------------------
def _round_up(x, m):
    return (x + m - 1) // m * m


def _pick_tile_f(F, max_tile_f=512):
    for t in (1024, 512, 256, 128):
        if t <= max_tile_f and F % t == 0:
            return t
    return F  # small / odd F: block equals the full array dim (still legal)


@functools.partial(jax.jit, static_argnames=("tile_n", "tile_f"))
def ffn_forward(x, w1, w2, wg=None, *, tile_n=256, tile_f=None):
    """x: [N, D]; w1: [D, F]; w2: [F, D]; wg: optional [D, F] (gated).

    tile_n: token tile (use 128 on v5e). tile_f: hidden-dim tile; auto-picked
    to a 128-multiple divisor of F when None.
    """
    N, D = x.shape
    F = w1.shape[1]
    gated = wg is not None

    if tile_f is None:
        tile_f = _pick_tile_f(F)
    assert F % tile_f == 0, "tile_f must divide feedforward_dim"
    n_f = F // tile_f

    # Token tile: multiple of 16 (covers f32 & bf16 sublane packing); pad N so
    # the grid divides evenly.  Zero padding rows is exact for this FFN.
    tile_n = _round_up(min(tile_n, N), 16)
    n_pad = _round_up(N, tile_n)
    if n_pad != N:
        x = jnp.pad(x, ((0, n_pad - N), (0, 0)))

    grid = (n_pad // tile_n, n_f)

    x_spec = pl.BlockSpec((tile_n, D), lambda i, f: (i, 0))
    w2_spec = pl.BlockSpec((tile_f, D), lambda i, f: (f, 0))
    out_spec = pl.BlockSpec((tile_n, D), lambda i, f: (i, 0))

    w_item = jnp.dtype(w1.dtype).itemsize
    x_item = jnp.dtype(x.dtype).itemsize

    if gated:
        # Interleave W1/Wg per F tile so each grid step reads one contiguous
        # (D, 2*tile_f) slice [W1_f | Wg_f] and issues a single matmul.
        # (In a real model this fusion is precomputed once at load time.)
        w1g = jnp.concatenate(
            [w1.reshape(D, n_f, tile_f), wg.reshape(D, n_f, tile_f)], axis=-1
        ).reshape(D, 2 * F)
        kernel = functools.partial(_ffn_gated_kernel, tile_f=tile_f)
        in_specs = [x_spec,
                    pl.BlockSpec((D, 2 * tile_f), lambda i, f: (0, f)),
                    w2_spec]
        args = (x, w1g, w2)
        w_slice_elems = D * 2 * tile_f + tile_f * D
        w_total_bytes = (2 * D * F + F * D) * w_item
        gate_flops = 2 * n_pad * D * F
    else:
        kernel = _ffn_kernel
        in_specs = [x_spec,
                    pl.BlockSpec((D, tile_f), lambda i, f: (0, f)),
                    w2_spec]
        args = (x, w1, w2)
        w_slice_elems = D * tile_f + tile_f * D
        w_total_bytes = 2 * D * F * w_item
        gate_flops = 0

    # Explicit VMEM budget: double-buffered weight slices + x/out tiles, the
    # f32 accumulator, headroom for the h intermediate and compiler scratch.
    vmem_needed = (
        2 * (w_slice_elems * w_item + 2 * tile_n * D * x_item)
        + tile_n * D * 4
        + tile_n * max(tile_f, 128) * 8
        + (4 << 20)
    )
    vmem_limit = int(min(max(vmem_needed, 16 << 20), 96 << 20))

    flops = 2 * n_pad * D * F * 2 + gate_flops
    bytes_accessed = int(w_total_bytes + 2 * n_pad * D * x_item)
    cost = pl.CostEstimate(flops=flops, transcendentals=0,
                           bytes_accessed=bytes_accessed)

    y = pl.pallas_call(
        kernel,
        out_shape=jax.ShapeDtypeStruct((n_pad, D), x.dtype),
        grid_spec=pltpu.PrefetchScalarGridSpec(
            num_scalar_prefetch=0,
            grid=grid,
            in_specs=in_specs,
            out_specs=out_spec,
            scratch_shapes=[pltpu.VMEM((tile_n, D), jnp.float32)],
        ),
        compiler_params=pltpu.CompilerParams(
            dimension_semantics=("parallel", "arbitrary"),
            vmem_limit_bytes=vmem_limit,
        ),
        cost_estimate=cost,
    )(*args)

    return y[:N] if n_pad != N else y


# --------------------------------------------------------------------------
# Reference / params
# --------------------------------------------------------------------------
def make_params(key, model_dim, feedforward_dim, gated=False, dtype=jnp.float32):
    """nn.Linear(bias=False)-style init, stored as [in, out]."""
    k1, k2, k3 = jax.random.split(key, 3)
    b1 = 1.0 / (model_dim ** 0.5)
    b2 = 1.0 / (feedforward_dim ** 0.5)
    w1 = jax.random.uniform(k1, (model_dim, feedforward_dim),
                            minval=-b1, maxval=b1, dtype=dtype)
    w2 = jax.random.uniform(k2, (feedforward_dim, model_dim),
                            minval=-b2, maxval=b2, dtype=dtype)
    wg = None
    if gated:
        wg = jax.random.uniform(k3, (model_dim, feedforward_dim),
                                minval=-b1, maxval=b1, dtype=dtype)
    return w1, w2, wg


def ffn_reference(x, w1, w2, wg=None):
    hp = jax.lax.Precision.HIGHEST
    h = jnp.dot(x, w1, precision=hp)
    if wg is not None:
        h = h * jnp.dot(x, wg, precision=hp)
    h = jnp.maximum(h, 0.0) ** 2
    return jnp.dot(h, w2, precision=hp)


if __name__ == "__main__":
    key = jax.random.PRNGKey(0)
    kx, kp, kpg = jax.random.split(key, 3)

    batch, seq, model_dim, ff_dim = 2, 8, 256, 1024
    x3 = jax.random.normal(kx, (batch, seq, model_dim), dtype=jnp.float32)
    x = x3.reshape(batch * seq, model_dim)  # tokens-major: [N, D]

    # --- default (non-gated) FFN ---
    w1, w2, _ = make_params(kp, model_dim, ff_dim, gated=False)
    y = ffn_forward(x, w1, w2)
    jax.block_until_ready(y)
    y_ref = ffn_reference(x, w1, w2)
    assert y.shape == (batch * seq, model_dim)
    assert jnp.allclose(y, y_ref, atol=2e-3, rtol=2e-3), \
        float(jnp.max(jnp.abs(y - y_ref)))

    # --- ragged N (exercises the zero-padding path) ---
    y_r = ffn_forward(x[:13], w1, w2)
    jax.block_until_ready(y_r)
    assert jnp.allclose(y_r, y_ref[:13], atol=2e-3, rtol=2e-3)

    # --- gated FFN ---
    w1g, w2g, wgg = make_params(kpg, model_dim, ff_dim, gated=True)
    yg = ffn_forward(x, w1g, w2g, wgg)
    jax.block_until_ready(yg)
    yg_ref = ffn_reference(x, w1g, w2g, wgg)
    assert jnp.allclose(yg, yg_ref, atol=2e-3, rtol=2e-3), \
        float(jnp.max(jnp.abs(yg - yg_ref)))

    print("KERNEL_OK")
</pallas_src>

<mosaic_0001>
module attributes {stable_mosaic.version = 11 : i64} {
  func.func @_ffn_kernel(%arg0: i32, %arg1: i32, %arg2: memref<16x256xf32, #tpu.memory_space<vmem>>, %arg3: memref<256x512xf32, #tpu.memory_space<vmem>>, %arg4: memref<512x256xf32, #tpu.memory_space<vmem>>, %arg5: memref<16x256xf32, #tpu.memory_space<vmem>>, %arg6: memref<16x256xf32, #tpu.memory_space<vmem>>) attributes {dimension_semantics = [#tpu.dimension_semantics<parallel>, #tpu.dimension_semantics<arbitrary>], iteration_bounds = array<i64: 1, 2>, scalar_prefetch = 0 : i64, scratch_operands = 1 : i64, tpu.core_type = #tpu.core_type<tc>, window_params = [{transform_indices = @transform_0, window_bounds = array<i64: 16, 256>}, {transform_indices = @transform_1, window_bounds = array<i64: 256, 512>}, {transform_indices = @transform_2, window_bounds = array<i64: 512, 256>}, {transform_indices = @transform_3, window_bounds = array<i64: 16, 256>}]} {
    %c0_i32 = arith.constant 0 : i32
    %0 = arith.cmpi eq, %arg1, %c0_i32 : i32
    %1 = arith.extui %0 : i1 to i32
    %c0_i32_0 = arith.constant 0 : i32
    %2 = arith.cmpi ne, %1, %c0_i32_0 : i32
    scf.if %2 {
      %cst_13 = arith.constant 0.000000e+00 : f32
      %17 = vector.broadcast %cst_13 : f32 to vector<16x256xf32>
      %c0_14 = arith.constant 0 : index
      %c0_15 = arith.constant 0 : index
      %18 = vector.load %arg6[%c0_14, %c0_15] : memref<16x256xf32, #tpu.memory_space<vmem>>, vector<16x256xf32>
      tpu.vector_store %arg6[%c0_14, %c0_15], %17 {strides = array<i32>} : memref<16x256xf32, #tpu.memory_space<vmem>>, vector<16x256xf32>,
    } else {
    }
    %c0 = arith.constant 0 : index
    %c0_1 = arith.constant 0 : index
    %3 = vector.load %arg2[%c0, %c0_1] : memref<16x256xf32, #tpu.memory_space<vmem>>, vector<16x256xf32>
    %c0_2 = arith.constant 0 : index
    %c0_3 = arith.constant 0 : index
    %4 = vector.load %arg3[%c0_2, %c0_3] : memref<256x512xf32, #tpu.memory_space<vmem>>, vector<256x512xf32>
    %cst = arith.constant dense<0.000000e+00> : vector<16x512xf32>
    %5 = tpu.matmul %3, %4, %cst {dimension_numbers = #tpu.dot_dimension_numbers<[1], [0], [0], [1], [0, 0, 1, 1], [], []>} : vector<16x256xf32>, vector<256x512xf32>, vector<16x512xf32> -> vector<16x512xf32>
    %cst_4 = arith.constant 0.000000e+00 : f32
    %6 = vector.broadcast %cst_4 : f32 to vector<16x512xf32>
    %7 = arith.maximumf %5, %6 : vector<16x512xf32>
    %8 = arith.mulf %7, %7 : vector<16x512xf32>
    %c0_5 = arith.constant 0 : index
    %c0_6 = arith.constant 0 : index
    %9 = vector.load %arg6[%c0_5, %c0_6] : memref<16x256xf32, #tpu.memory_space<vmem>>, vector<16x256xf32>
    %c0_7 = arith.constant 0 : index
    %c0_8 = arith.constant 0 : index
    %10 = vector.load %arg4[%c0_7, %c0_8] : memref<512x256xf32, #tpu.memory_space<vmem>>, vector<512x256xf32>
    %cst_9 = arith.constant dense<0.000000e+00> : vector<16x256xf32>
    %11 = tpu.matmul %8, %10, %cst_9 {dimension_numbers = #tpu.dot_dimension_numbers<[1], [0], [0], [1], [0, 0, 1, 1], [], []>} : vector<16x512xf32>, vector<512x256xf32>, vector<16x256xf32> -> vector<16x256xf32>
    %12 = arith.addf %9, %11 : vector<16x256xf32>
    %c0_10 = arith.constant 0 : index
    %c0_11 = arith.constant 0 : index
    %13 = vector.load %arg6[%c0_10, %c0_11] : memref<16x256xf32, #tpu.memory_space<vmem>>, vector<16x256xf32>
    tpu.vector_store %arg6[%c0_10, %c0_11], %12 {strides = array<i32>} : memref<16x256xf32, #tpu.memory_space<vmem>>, vector<16x256xf32>,
    %c1_i32 = arith.constant 1 : i32
    %14 = arith.cmpi eq, %arg1, %c1_i32 : i32
    %15 = arith.extui %14 : i1 to i32
    %c0_i32_12 = arith.constant 0 : i32
    %16 = arith.cmpi ne, %15, %c0_i32_12 : i32
    scf.if %16 {
      %c0_13 = arith.constant 0 : index
      %c0_14 = arith.constant 0 : index
      %17 = vector.load %arg6[%c0_13, %c0_14] : memref<16x256xf32, #tpu.memory_space<vmem>>, vector<16x256xf32>
      %c0_15 = arith.constant 0 : index
      %c0_16 = arith.constant 0 : index
      %18 = vector.load %arg5[%c0_15, %c0_16] : memref<16x256xf32, #tpu.memory_space<vmem>>, vector<16x256xf32>
      tpu.vector_store %arg5[%c0_15, %c0_16], %17 {strides = array<i32>} : memref<16x256xf32, #tpu.memory_space<vmem>>, vector<16x256xf32>,
    } else {
    }
    return
  }
  func.func @transform_0(%arg0: i32, %arg1: i32) -> (i32, i32) {
    %c0_i32 = arith.constant 0 : i32
    %c0_i32_0 = arith.constant 0 : i32
    return %arg0, %c0_i32 : i32, i32
  }
  func.func @transform_1(%arg0: i32, %arg1: i32) -> (i32, i32) {
    %c0_i32 = arith.constant 0 : i32
    %c0_i32_0 = arith.constant 0 : i32
    return %c0_i32, %arg1 : i32, i32
  }
  func.func @transform_2(%arg0: i32, %arg1: i32) -> (i32, i32) {
    %c0_i32 = arith.constant 0 : i32
    %c0_i32_0 = arith.constant 0 : i32
    return %arg1, %c0_i32 : i32, i32
  }
  func.func @transform_3(%arg0: i32, %arg1: i32) -> (i32, i32) {
    %c0_i32 = arith.constant 0 : i32
    %c0_i32_0 = arith.constant 0 : i32
    return %arg0, %c0_i32 : i32, i32
  }
}

</mosaic_0001>

<bundles_post_ra>
// kernel: ffn_forward.1
= control target key start
LH: loop header
LB: loop body
LE: loop exit
PB: predicated region body
PF: predicated region fallthrough
CT: control target
= control target key end

     0   :  { %8 = vsyncpa [#allocation4], 0  ;;  %s1715_s0 = inlined_call_operand.hbm [shape: f32[16,256], index: 0, kind: input, shape index: {}]   ;;  %s1716_s1 = inlined_call_operand.hbm [shape: f32[256,1024], index: 1, kind: input, shape index: {}]   ;;  %s1717_s2 = inlined_call_operand.hbm [shape: f32[1024,256], index: 2, kind: input, shape index: {}]   ;;  %s1718_s3 = inlined_call_operand.hbm [shape: f32[16,256], index: 3, kind: output, shape index: {}]  }
   0x1   :  { %9 = vsyncpa [#allocation7], 0 }
   0x2   :  { %11 = vsyncpa [#allocation7 + $0x1], 0 }
   0x3   :  { %12 = vsyncpa [#allocation5], 0  ;;  %s1292_s12 = smov 0   ;;  %s1294_s13 = smov 0  }
   0x4   :  { %s1296_s14 = smov 0   ;;  %s1298_s15 = smov 0  }
   0x5   :  { %s1300_s16 = smov 0   ;;  %s1302_s17 = smov 0  }
   0x6 LB: > { %s27_s18 = sadd.s32 1, %s1254_s16  ;;  %s63_s19 = sadd.s32 1, %s1246_s14  ;;  %s1258_s17 = sphi %s1302_s17, %s18_s17   ;;  %s1254_s16 = sphi %s1300_s16, %s1727_s16   ;;  %s1250_s15 = sphi %s1298_s15, %s1726_s15   ;;  %s1246_s14 = sphi %s1296_s14, %s1725_s14   ;;  %s1242_s13 = sphi %s1294_s13, %s1724_s13   ;;  %s1238_s12 = sphi %s1292_s12, %s1723_s12  }
   0x7   : > { %p28_p0 = scmp.ge.s32.totalorder %s27_s18, 2  ;;  %p70_p1 = scmp.ne.s32.totalorder %s1246_s14, %s1242_s13 }
   0x8   : > { %p71_p2 = scmp.eq.s32.totalorder %s1258_s17, 0  ;;  %p1032_p4 = scmp.lt.s32.totalorder %s1258_s17, 2 }
   0x9   : > { %s1729_s18 = smov (%p28_p0, %s27_s18), 0  ;;  %s169_s21 = sand.u32 1, %s1258_s17  }
   0xa   : > { %p72_p3 = por %p71_p2, %p70_p1  ;;  %s60_s20 = ssub.s32 %s1254_s16, %s1729_s18 }
   0xb   : > { %p61_p5 = scmp.eq.s32.totalorder %s60_s20, 0  ;;  %s171_s22 = sand.u32 1, %s1246_s14  }
   0xc   : > { %s1005_s23 = sshll.u32 %s1254_s16, 9  ;;  %s1338_s25 = sshll.u32 %s171_s22, 10 }
   0xd   : > { %s1336_s24 = scalar_select %p61_p5, %s1246_s14, %s63_s19  }
   0xe   : > { %s179_s28 = scalar_lea.hbm %s1716_s1, %s1005_s23  ;;  %p1343_p6 = pnand %p1032_p4, %p72_p3 }
   0xf   : > { %s173_s30 = scalar_lea.vmem [#allocation6], %s1338_s25  ;;  %s1348_s5 = scalar_lea.sflag [#allocation7], %s169_s21 }
  0x10   : > { %s180_s4 = sshll.u32 %s173_s30, 4  ;;  %p1096_p7 = pneg %p1343_p6  ;;  %s181_s4 = int_to_ptr.vmem [resolvable:$true] %s180_s4 }
  0x11   : > { %s1107_s6 = scalar_lea.vmem %s181_s4, 16384  ;;  %s1260_s7 = smov [#allocation6]  }
  0x12   : > { %p1108_p8 = scmp.ne.s32.totalorder %s181_s4, %s1107_s6  ;;  %s1112_s8 = sshll.u32 %s1260_s7, 4  ;;  %s1113_s8 = int_to_ptr.vmem [resolvable:$false] %s1112_s8 }
  0x13   : > { %s1114_s9 = scalar_lea.vmem %s1113_s8, 32768  ;;  %p1115_p11 = scmp.lt.s32.totalorder %s181_s4, %s1113_s8 }
  0x14   : > { %p1110_p9 = pnand %p1108_p8, %p1096_p7  ;;  %p1116_p12 = scmp.lt.s32.totalorder %s1114_s9, %s1107_s6 }
  0x16   : > { %p1111_p10 = pneg %p1110_p9  ;;  %p1117_p13 = por %p1116_p12, %p1115_p11 }
  0x18   : > { %p1118_p0 = pnand %p1117_p13, %p1111_p10 }
  0x1a   : > { %1121 = shalt.err (!%p1118_p0)
}
  0x1b   : > { %s1261_s10 = smov 1024   ;;  %s1262_s11 = smov 512  }
  0x1c   : > { %s1263_s19 = smov 32   ;;  %s1359_s20 = sadd.s32 4294967295, %s1258_s17  }
  0x1d   : > { %1027 = dma.hbm_to_vmem [thread:$0]  (!%p1343_p6), %s179_s28, 16384, %s181_s4, %s1348_s5, %s1261_s10, %s1262_s11, %s1263_s19  }
  0x1e   : > { %p76_p1 = scmp.ne.s32.totalorder %s1242_s13, %s1238_s12  ;;  %p77_p2 = scmp.eq.s32.totalorder %s1359_s20, 0 }
  0x1f   : > { %p985_p3 = scmp.ge.s32.totalorder %s1258_s17, 1  ;;  %p139_p4 = scmp.lt.s32.totalorder %s1258_s17, 3 }
  0x20   : > { %p1368_p5 = por %p77_p2, %p76_p1  ;;  %s1264_s23 = smov [#allocation3]  }
  0x21   : > { %p1372_p8 = pnand %p985_p3, %p139_p4  ;;  %s155_s26 = sshll.u32 %s1264_s23, 4  ;;  %s156_s26 = int_to_ptr.vmem [resolvable:$true] %s155_s26 }
  0x22   : > { %s1007_s27 = sshll.u32 %s1254_s16, 14  ;;  %s194_s6 = scalar_lea.vmem [#allocation8], %s1338_s25 }
  0x23   : > { %p1020_p9 = pneg %p1372_p8  ;;  %s1388_s4 = scalar_lea.hbm %s1717_s2, %s1007_s27 }
  0x24   : > { %s202_s7 = sshll.u32 %s194_s6, 4  ;;  %s1133_s8 = scalar_lea.vmem %s156_s26, 512  ;;  %s1391_s7 = int_to_ptr.vmem [resolvable:$true] %s202_s7 }
  0x25   : > { %p1381_p10 = pnand %p1020_p9, %p77_p2  ;;  %p1134_p12 = scmp.ne.s32.totalorder %s156_s26, %s1133_s8 }
  0x26   : > { %p1141_p1 = scmp.lt.s32.totalorder %s156_s26, %s156_s26  ;;  %p1142_p3 = scmp.lt.s32.totalorder %s1133_s8, %s1133_s8 }
  0x27   : > { %p1124_p11 = pneg %p1381_p10 }
  0x28   : > { %p1143_p4 = por %p1142_p3, %p1141_p1 }
  0x29   : > { %p1136_p13 = pnand %p1134_p12, %p1124_p11 }
  0x2b   : > { %p1137_p0 = pneg %p1136_p13 }
  0x2d   : > { %p1144_p9 = pnand %p1143_p4, %p1137_p0 }
  0x2f   : > { %1147 = shalt.err (!%p1144_p9)
}
  0x30   : > { %s1265_s9 = smov 256   ;;  %s1266_s25 = smov 16  }
  0x31   : > { %1023 = dma.hbm_to_vmem [thread:$0]  (!%p1381_p10), %s1715_s0, 512, %s156_s26, [#allocation4], %s1265_s9, %s1265_s9, %s1266_s25  }
  0x32   : > { %s1161_s19 = scalar_lea.vmem %s1391_s7, 16384  ;;  %s1267_s23 = smov [#allocation8]  }
  0x33   : > { %p1162_p11 = scmp.ne.s32.totalorder %s1391_s7, %s1161_s19  ;;  %s1166_s27 = sshll.u32 %s1267_s23, 4  ;;  %s1167_s27 = int_to_ptr.vmem [resolvable:$false] %s1166_s27 }
  0x34   : > { %s1168_s28 = scalar_lea.vmem %s1167_s27, 32768  ;;  %p1169_p0 = scmp.lt.s32.totalorder %s1391_s7, %s1167_s27 }
  0x35   : > { %p1164_p12 = pnand %p1162_p11, %p1096_p7  ;;  %p1170_p1 = scmp.lt.s32.totalorder %s1168_s28, %s1161_s19 }
  0x37   : > { %p1165_p13 = pneg %p1164_p12  ;;  %p1171_p3 = por %p1170_p1, %p1169_p0 }
  0x39   : > { %p1172_p4 = pnand %p1171_p3, %p1165_p13 }
  0x3b   : > { %1175 = shalt.err (!%p1172_p4)
}
  0x3c   : > { %1030 = dma.hbm_to_vmem [thread:$0]  (!%p1343_p6), %s1388_s4, 16384, %s1391_s7, %s1348_s5, %s1265_s9, %s1265_s9, %s1266_s25  }
  0x3d   : > { %214 = sbr.rel (%p1372_p8) target bundleno = 575 (0x23f), region = 32 }
  0x42   : > { %1225 = dma.done.wait (%p77_p2), [#allocation4], 512  }
  0x43   : > { %1227 = vsyncadd (%p77_p2), [#allocation4], 4294966784  ;;  %s220_s26 = sand.u32 1, %s1359_s20   ;;  %s222_s12 = sand.u32 1, %s1242_s13  }
  0x44   : > { %s997_s30 = sshll.u32 %s222_s12, 10  ;;  %s221_s29 = scalar_lea.sflag [#allocation7], %s220_s26 }
  0x45   : > { %s1419_s6 = scalar_lea.vmem [#allocation6], %s997_s30 }
  0x46   : > { %1229 = dma.done.wait (%p1368_p5), %s221_s29, 32768  }
  0x47   : > { %1231 = vsyncadd (%p1368_p5), %s221_s29, 4294934528  ;;  %s1425_s5 = scalar_lea.vmem [#allocation8], %s997_s30  ;;  %p999_p6 = scmp.ne.s32.totalorder %s1250_s15, 0 }
  0x49   : > { %263 = sbr.rel (%p999_p6) target bundleno = 81 (0x51), region = 48 }
  0x4e   : > { %v1268_v0 = vmov 0.0  }
  0x4f   : > { %264 = vst [vmem:[#allocation2 + $0x10] sm:$0xff] %v1268_v0  ;;  %265 = vst [vmem:[#allocation2] sm:$0xff] %v1268_v0 }
  0x50   : > { %266 = vst [vmem:[#allocation2 + $0x18] sm:$0xff] %v1268_v0  ;;  %267 = vst [vmem:[#allocation2 + $0x8] sm:$0xff] %v1268_v0 }
  0x51 PF: > { %v333_v1 = vld [vmem:[%s1419_s6 + $0x1e8] sm:$0xff]  ;;  %v335_v2 = vld [vmem:[%s1419_s6 + $0x1f8] sm:$0xff]  ;;  %v332_v3 = vld [vmem:[%s1419_s6 + $0x1e0] sm:$0xff]  ;;  %p1000_p7 = scmp.ne.s32.totalorder %s1250_s15, 1 }
  0x52   : > { %400 = vmatprep.subr.mxu0 %v333_v1  ;;  %477 = vmatprep.subr.mxu1 %v335_v2  ;;  %v334_v4 = vld [vmem:[%s1419_s6 + $0x1f0] sm:$0xff]  ;;  %v329_v5 = vld [vmem:[%s1419_s6 + $0x1c8] sm:$0xff]  ;;  %v331_v6 = vld [vmem:[%s1419_s6 + $0x1d8] sm:$0xff] }
  0x53   : > { %401 = vmatpush1.msra.mxu0 %v332_v3  ;;  %478 = vmatpush1.msra.mxu1 %v334_v4  ;;  %v328_v7 = vld [vmem:[%s1419_s6 + $0x1c0] sm:$0xff]  ;;  %v330_v8 = vld [vmem:[%s1419_s6 + $0x1d0] sm:$0xff]  ;;  %v325_v9 = vld [vmem:[%s1419_s6 + $0x1a8] sm:$0xff] }
  0x54   : > { %402 = vmatprep.subr.mxu0 %v329_v5  ;;  %479 = vmatprep.subr.mxu1 %v331_v6  ;;  %v327_v10 = vld [vmem:[%s1419_s6 + $0x1b8] sm:$0xff]  ;;  %v324_v11 = vld [vmem:[%s1419_s6 + $0x1a0] sm:$0xff]  ;;  %v326_v12 = vld [vmem:[%s1419_s6 + $0x1b0] sm:$0xff] }
  0x55   : > { %403 = vmatpush1.msra.mxu0 %v328_v7  ;;  %480 = vmatpush1.msra.mxu1 %v330_v8  ;;  %v321_v13 = vld [vmem:[%s1419_s6 + $0x188] sm:$0xff]  ;;  %v323_v14 = vld [vmem:[%s1419_s6 + $0x198] sm:$0xff]  ;;  %v320_v15 = vld [vmem:[%s1419_s6 + $0x180] sm:$0xff] }
  0x56   : > { %404 = vmatprep.subr.mxu0 %v325_v9  ;;  %481 = vmatprep.subr.mxu1 %v327_v10  ;;  %v322_v16 = vld [vmem:[%s1419_s6 + $0x190] sm:$0xff]  ;;  %v317_v17 = vld [vmem:[%s1419_s6 + $0x168] sm:$0xff]  ;;  %v319_v18 = vld [vmem:[%s1419_s6 + $0x178] sm:$0xff] }
  0x57   : > { %405 = vmatpush1.msra.mxu0 %v324_v11  ;;  %482 = vmatpush1.msra.mxu1 %v326_v12  ;;  %v316_v19 = vld [vmem:[%s1419_s6 + $0x160] sm:$0xff]  ;;  %v318_v20 = vld [vmem:[%s1419_s6 + $0x170] sm:$0xff]  ;;  %v313_v21 = vld [vmem:[%s1419_s6 + $0x148] sm:$0xff] }
  0x58   : > { %406 = vmatprep.subr.mxu0 %v321_v13  ;;  %483 = vmatprep.subr.mxu1 %v323_v14  ;;  %v315_v22 = vld [vmem:[%s1419_s6 + $0x158] sm:$0xff]  ;;  %v312_v23 = vld [vmem:[%s1419_s6 + $0x140] sm:$0xff]  ;;  %v314_v24 = vld [vmem:[%s1419_s6 + $0x150] sm:$0xff] }
  0x59   : > { %407 = vmatpush1.msra.mxu0 %v320_v15  ;;  %484 = vmatpush1.msra.mxu1 %v322_v16  ;;  %v309_v25 = vld [vmem:[%s1419_s6 + $0x128] sm:$0xff]  ;;  %v311_v26 = vld [vmem:[%s1419_s6 + $0x138] sm:$0xff]  ;;  %v308_v27 = vld [vmem:[%s1419_s6 + $0x120] sm:$0xff] }
  0x5a   : > { %408 = vmatprep.subr.mxu0 %v317_v17  ;;  %485 = vmatprep.subr.mxu1 %v319_v18  ;;  %v310_v28 = vld [vmem:[%s1419_s6 + $0x130] sm:$0xff]  ;;  %v305_v29 = vld [vmem:[%s1419_s6 + $0x108] sm:$0xff]  ;;  %v307_v30 = vld [vmem:[%s1419_s6 + $0x118] sm:$0xff] }
  0x5b   : > { %409 = vmatpush1.msra.mxu0 %v316_v19  ;;  %486 = vmatpush1.msra.mxu1 %v318_v20  ;;  %v304_v31 = vld [vmem:[%s1419_s6 + $0x100] sm:$0xff]  ;;  %v306_v32 = vld [vmem:[%s1419_s6 + $0x110] sm:$0xff]  ;;  %v301_v33 = vld [vmem:[%s1419_s6 + $0xe8] sm:$0xff] }
  0x5c   : > { %410 = vmatprep.subr.mxu0 %v313_v21  ;;  %487 = vmatprep.subr.mxu1 %v315_v22  ;;  %v303_v34 = vld [vmem:[%s1419_s6 + $0xf8] sm:$0xff]  ;;  %v300_v35 = vld [vmem:[%s1419_s6 + $0xe0] sm:$0xff]  ;;  %v302_v36 = vld [vmem:[%s1419_s6 + $0xf0] sm:$0xff] }
  0x5d   : > { %411 = vmatpush1.msra.mxu0 %v312_v23  ;;  %488 = vmatpush1.msra.mxu1 %v314_v24  ;;  %v297_v37 = vld [vmem:[%s1419_s6 + $0xc8] sm:$0xff]  ;;  %v299_v38 = vld [vmem:[%s1419_s6 + $0xd8] sm:$0xff]  ;;  %v296_v39 = vld [vmem:[%s1419_s6 + $0xc0] sm:$0xff] }
  0x5e   : > { %412 = vmatprep.subr.mxu0 %v309_v25  ;;  %489 = vmatprep.subr.mxu1 %v311_v26  ;;  %v298_v40 = vld [vmem:[%s1419_s6 + $0xd0] sm:$0xff]  ;;  %v293_v41 = vld [vmem:[%s1419_s6 + $0xa8] sm:$0xff]  ;;  %v295_v42 = vld [vmem:[%s1419_s6 + $0xb8] sm:$0xff] }
  0x5f   : > { %413 = vmatpush1.msra.mxu0 %v308_v27  ;;  %490 = vmatpush1.msra.mxu1 %v310_v28  ;;  %v292_v43 = vld [vmem:[%s1419_s6 + $0xa0] sm:$0xff]  ;;  %v294_v44 = vld [vmem:[%s1419_s6 + $0xb0] sm:$0xff]  ;;  %v289_v45 = vld [vmem:[%s1419_s6 + $0x88] sm:$0xff] }
  0x60   : > { %414 = vmatprep.subr.mxu0 %v305_v29  ;;  %491 = vmatprep.subr.mxu1 %v307_v30  ;;  %v291_v46 = vld [vmem:[%s1419_s6 + $0x98] sm:$0xff]  ;;  %v288_v47 = vld [vmem:[%s1419_s6 + $0x80] sm:$0xff]  ;;  %v290_v48 = vld [vmem:[%s1419_s6 + $0x90] sm:$0xff] }
  0x61   : > { %415 = vmatpush1.msra.mxu0 %v304_v31  ;;  %492 = vmatpush1.msra.mxu1 %v306_v32  ;;  %v285_v49 = vld [vmem:[%s1419_s6 + $0x68] sm:$0xff]  ;;  %v287_v50 = vld [vmem:[%s1419_s6 + $0x78] sm:$0xff]  ;;  %v284_v51 = vld [vmem:[%s1419_s6 + $0x60] sm:$0xff] }
  0x62   : > { %416 = vmatprep.subr.mxu0 %v301_v33  ;;  %493 = vmatprep.subr.mxu1 %v303_v34  ;;  %v286_v52 = vld [vmem:[%s1419_s6 + $0x70] sm:$0xff]  ;;  %v281_v53 = vld [vmem:[%s1419_s6 + $0x48] sm:$0xff]  ;;  %v283_v54 = vld [vmem:[%s1419_s6 + $0x58] sm:$0xff] }
  0x63   : > { %417 = vmatpush1.msra.mxu0 %v300_v35  ;;  %494 = vmatpush1.msra.mxu1 %v302_v36  ;;  %v280_v55 = vld [vmem:[%s1419_s6 + $0x40] sm:$0xff]  ;;  %v282_v56 = vld [vmem:[%s1419_s6 + $0x50] sm:$0xff]  ;;  %v277_v57 = vld [vmem:[%s1419_s6 + $0x28] sm:$0xff] }
  0x64   : > { %418 = vmatprep.subr.mxu0 %v297_v37  ;;  %495 = vmatprep.subr.mxu1 %v299_v38  ;;  %v279_v58 = vld [vmem:[%s1419_s6 + $0x38] sm:$0xff]  ;;  %v276_v59 = vld [vmem:[%s1419_s6 + $0x20] sm:$0xff]  ;;  %v278_v60 = vld [vmem:[%s1419_s6 + $0x30] sm:$0xff] }
  0x65   : > { %419 = vmatpush1.msra.mxu0 %v296_v39  ;;  %496 = vmatpush1.msra.mxu1 %v298_v40  ;;  %v273_v61 = vld [vmem:[%s1419_s6 + $0x8] sm:$0xff]  ;;  %v275_v62 = vld [vmem:[%s1419_s6 + $0x18] sm:$0xff]  ;;  %v272_v63 = vld [vmem:[%s1419_s6] sm:$0xff] }
  0x66   : > { %420 = vmatprep.subr.mxu0 %v293_v41  ;;  %497 = vmatprep.subr.mxu1 %v295_v42  ;;  %v274_v0 = vld [vmem:[%s1419_s6 + $0x10] sm:$0xff]  ;;  %v397_v1 = vld [vmem:[%s1419_s6 + $0x3e8] sm:$0xff]  ;;  %v399_v2 = vld [vmem:[%s1419_s6 + $0x3f8] sm:$0xff] }
  0x67   : > { %421 = vmatpush1.msra.mxu0 %v292_v43  ;;  %498 = vmatpush1.msra.mxu1 %v294_v44  ;;  %v396_v3 = vld [vmem:[%s1419_s6 + $0x3e0] sm:$0xff]  ;;  %v398_v4 = vld [vmem:[%s1419_s6 + $0x3f0] sm:$0xff]  ;;  %v393_v5 = vld [vmem:[%s1419_s6 + $0x3c8] sm:$0xff] }
  0x68   : > { %422 = vmatprep.subr.mxu0 %v289_v45  ;;  %499 = vmatprep.subr.mxu1 %v291_v46  ;;  %v395_v6 = vld [vmem:[%s1419_s6 + $0x3d8] sm:$0xff]  ;;  %v392_v7 = vld [vmem:[%s1419_s6 + $0x3c0] sm:$0xff]  ;;  %v394_v8 = vld [vmem:[%s1419_s6 + $0x3d0] sm:$0xff] }
  0x69   : > { %423 = vmatpush1.msra.mxu0 %v288_v47  ;;  %500 = vmatpush1.msra.mxu1 %v290_v48  ;;  %v389_v9 = vld [vmem:[%s1419_s6 + $0x3a8] sm:$0xff]  ;;  %v391_v10 = vld [vmem:[%s1419_s6 + $0x3b8] sm:$0xff]  ;;  %v388_v11 = vld [vmem:[%s1419_s6 + $0x3a0] sm:$0xff] }
  0x6a   : > { %424 = vmatprep.subr.mxu0 %v285_v49  ;;  %501 = vmatprep.subr.mxu1 %v287_v50  ;;  %v390_v12 = vld [vmem:[%s1419_s6 + $0x3b0] sm:$0xff]  ;;  %v385_v13 = vld [vmem:[%s1419_s6 + $0x388] sm:$0xff]  ;;  %v387_v14 = vld [vmem:[%s1419_s6 + $0x398] sm:$0xff] }
  0x6b   : > { %425 = vmatpush1.msra.mxu0 %v284_v51  ;;  %502 = vmatpush1.msra.mxu1 %v286_v52  ;;  %v384_v15 = vld [vmem:[%s1419_s6 + $0x380] sm:$0xff]  ;;  %v386_v16 = vld [vmem:[%s1419_s6 + $0x390] sm:$0xff]  ;;  %v381_v17 = vld [vmem:[%s1419_s6 + $0x368] sm:$0xff] }
  0x6c   : > { %426 = vmatprep.subr.mxu0 %v281_v53  ;;  %503 = vmatprep.subr.mxu1 %v283_v54  ;;  %v383_v18 = vld [vmem:[%s1419_s6 + $0x378] sm:$0xff]  ;;  %v380_v19 = vld [vmem:[%s1419_s6 + $0x360] sm:$0xff]  ;;  %v382_v20 = vld [vmem:[%s1419_s6 + $0x370] sm:$0xff] }
  0x6d   : > { %427 = vmatpush1.msra.mxu0 %v280_v55  ;;  %504 = vmatpush1.msra.mxu1 %v282_v56  ;;  %v377_v21 = vld [vmem:[%s1419_s6 + $0x348] sm:$0xff]  ;;  %v379_v22 = vld [vmem:[%s1419_s6 + $0x358] sm:$0xff]  ;;  %v376_v23 = vld [vmem:[%s1419_s6 + $0x340] sm:$0xff] }
  0x6e   : > { %428 = vmatprep.subr.mxu0 %v277_v57  ;;  %505 = vmatprep.subr.mxu1 %v279_v58  ;;  %v378_v24 = vld [vmem:[%s1419_s6 + $0x350] sm:$0xff]  ;;  %v373_v25 = vld [vmem:[%s1419_s6 + $0x328] sm:$0xff]  ;;  %v375_v26 = vld [vmem:[%s1419_s6 + $0x338] sm:$0xff] }
  0x6f   : > { %429 = vmatpush1.msra.mxu0 %v276_v59  ;;  %506 = vmatpush1.msra.mxu1 %v278_v60  ;;  %v372_v27 = vld [vmem:[%s1419_s6 + $0x320] sm:$0xff]  ;;  %v374_v28 = vld [vmem:[%s1419_s6 + $0x330] sm:$0xff]  ;;  %v369_v29 = vld [vmem:[%s1419_s6 + $0x308] sm:$0xff] }
  0x70   : > { %430 = vmatprep.subr.mxu0 %v273_v61  ;;  %507 = vmatprep.subr.mxu1 %v275_v62  ;;  %v371_v30 = vld [vmem:[%s1419_s6 + $0x318] sm:$0xff]  ;;  %v368_v31 = vld [vmem:[%s1419_s6 + $0x300] sm:$0xff]  ;;  %v370_v32 = vld [vmem:[%s1419_s6 + $0x310] sm:$0xff] }
  0x71   : > { %431 = vmatpush1.msra.mxu0 %v272_v63  ;;  %508 = vmatpush1.msra.mxu1 %v274_v0  ;;  %v365_v33 = vld [vmem:[%s1419_s6 + $0x2e8] sm:$0xff]  ;;  %v367_v34 = vld [vmem:[%s1419_s6 + $0x2f8] sm:$0xff]  ;;  %v364_v35 = vld [vmem:[%s1419_s6 + $0x2e0] sm:$0xff] }
  0x72   : > { %432 = vmatprep.subr.mxu0 %v397_v1  ;;  %509 = vmatprep.subr.mxu1 %v399_v2  ;;  %v366_v36 = vld [vmem:[%s1419_s6 + $0x2f0] sm:$0xff]  ;;  %v361_v37 = vld [vmem:[%s1419_s6 + $0x2c8] sm:$0xff]  ;;  %v363_v38 = vld [vmem:[%s1419_s6 + $0x2d8] sm:$0xff] }
  0x73   : > { %433 = vmatpush2.msra.mxu0 %v396_v3  ;;  %510 = vmatpush2.msra.mxu1 %v398_v4  ;;  %v360_v39 = vld [vmem:[%s1419_s6 + $0x2c0] sm:$0xff]  ;;  %v362_v40 = vld [vmem:[%s1419_s6 + $0x2d0] sm:$0xff]  ;;  %v357_v41 = vld [vmem:[%s1419_s6 + $0x2a8] sm:$0xff] }
  0x74   : > { %434 = vmatprep.subr.mxu0 %v393_v5  ;;  %511 = vmatprep.subr.mxu1 %v395_v6  ;;  %v359_v42 = vld [vmem:[%s1419_s6 + $0x2b8] sm:$0xff]  ;;  %v356_v43 = vld [vmem:[%s1419_s6 + $0x2a0] sm:$0xff]  ;;  %v358_v44 = vld [vmem:[%s1419_s6 + $0x2b0] sm:$0xff] }
  0x75   : > { %435 = vmatpush2.msra.mxu0 %v392_v7  ;;  %512 = vmatpush2.msra.mxu1 %v394_v8  ;;  %v353_v45 = vld [vmem:[%s1419_s6 + $0x288] sm:$0xff]  ;;  %v355_v46 = vld [vmem:[%s1419_s6 + $0x298] sm:$0xff]  ;;  %v352_v47 = vld [vmem:[%s1419_s6 + $0x280] sm:$0xff] }
  0x76   : > { %436 = vmatprep.subr.mxu0 %v389_v9  ;;  %513 = vmatprep.subr.mxu1 %v391_v10  ;;  %v354_v48 = vld [vmem:[%s1419_s6 + $0x290] sm:$0xff]  ;;  %v349_v49 = vld [vmem:[%s1419_s6 + $0x268] sm:$0xff]  ;;  %v351_v50 = vld [vmem:[%s1419_s6 + $0x278] sm:$0xff] }
  0x77   : > { %437 = vmatpush2.msra.mxu0 %v388_v11  ;;  %514 = vmatpush2.msra.mxu1 %v390_v12  ;;  %v348_v51 = vld [vmem:[%s1419_s6 + $0x260] sm:$0xff]  ;;  %v350_v52 = vld [vmem:[%s1419_s6 + $0x270] sm:$0xff]  ;;  %v345_v53 = vld [vmem:[%s1419_s6 + $0x248] sm:$0xff] }
  0x78   : > { %438 = vmatprep.subr.mxu0 %v385_v13  ;;  %515 = vmatprep.subr.mxu1 %v387_v14  ;;  %v347_v54 = vld [vmem:[%s1419_s6 + $0x258] sm:$0xff]  ;;  %v344_v55 = vld [vmem:[%s1419_s6 + $0x240] sm:$0xff]  ;;  %v346_v56 = vld [vmem:[%s1419_s6 + $0x250] sm:$0xff] }
  0x79   : > { %439 = vmatpush2.msra.mxu0 %v384_v15  ;;  %516 = vmatpush2.msra.mxu1 %v386_v16  ;;  %v341_v57 = vld [vmem:[%s1419_s6 + $0x228] sm:$0xff]  ;;  %v343_v58 = vld [vmem:[%s1419_s6 + $0x238] sm:$0xff]  ;;  %v340_v59 = vld [vmem:[%s1419_s6 + $0x220] sm:$0xff] }
  0x7a   : > { %440 = vmatprep.subr.mxu0 %v381_v17  ;;  %517 = vmatprep.subr.mxu1 %v383_v18  ;;  %v342_v60 = vld [vmem:[%s1419_s6 + $0x230] sm:$0xff]  ;;  %v337_v61 = vld [vmem:[%s1419_s6 + $0x208] sm:$0xff]  ;;  %v339_v62 = vld [vmem:[%s1419_s6 + $0x218] sm:$0xff] }
  0x7b   : > { %441 = vmatpush2.msra.mxu0 %v380_v19  ;;  %518 = vmatpush2.msra.mxu1 %v382_v20  ;;  %v336_v63 = vld [vmem:[%s1419_s6 + $0x200] sm:$0xff]  ;;  %v269_v0 = vld [vmem:[#allocation3 + $0x8] sm:$0xff]  ;;  %v338_v1 = vld [vmem:[%s1419_s6 + $0x210] sm:$0xff] }
  0x7c   : > { %442 = vmatprep.subr.mxu0 %v377_v21  ;;  %519 = vmatprep.subr.mxu1 %v379_v22  ;;  %v268_v2 = vld [vmem:[#allocation3] sm:$0xff]  ;;  %v271_v3 = vld [vmem:[#allocation3 + $0x18] sm:$0xff]  ;;  %v604_v6 = vld [vmem:[%s1425_s5 + $0xf0] sm:$0xff] }
  0x7d   : > { %443 = vmatpush2.msra.mxu0 %v376_v23  ;;  %520 = vmatpush2.msra.mxu1 %v378_v24  ;;  %v605_v4 = vld [vmem:[%s1425_s5 + $0xf8] sm:$0xff]  ;;  %v668_v7 = vld [vmem:[%s1425_s5 + $0x2f0] sm:$0xff]  ;;  %v603_v9 = vld [vmem:[%s1425_s5 + $0xe8] sm:$0xff] }
  0x7e   : > { %444 = vmatprep.subr.mxu0 %v373_v25  ;;  %521 = vmatprep.subr.mxu1 %v375_v26  ;;  %v669_v5 = vld [vmem:[%s1425_s5 + $0x2f8] sm:$0xff]  ;;  %v270_v8 = vld [vmem:[#allocation3 + $0x10] sm:$0xff]  ;;  %v667_v10 = vld [vmem:[%s1425_s5 + $0x2e8] sm:$0xff] }
  0x7f   : > { %445 = vmatpush2.msra.mxu0 %v372_v27  ;;  %522 = vmatpush2.msra.mxu1 %v374_v28  ;;  %v602_v11 = vld [vmem:[%s1425_s5 + $0xe0] sm:$0xff]  ;;  %v601_v13 = vld [vmem:[%s1425_s5 + $0xd8] sm:$0xff]  ;;  %v600_v15 = vld [vmem:[%s1425_s5 + $0xd0] sm:$0xff] }
  0x80   : > { %446 = vmatprep.subr.mxu0 %v369_v29  ;;  %523 = vmatprep.subr.mxu1 %v371_v30  ;;  %v666_v12 = vld [vmem:[%s1425_s5 + $0x2e0] sm:$0xff]  ;;  %v665_v14 = vld [vmem:[%s1425_s5 + $0x2d8] sm:$0xff]  ;;  %v664_v16 = vld [vmem:[%s1425_s5 + $0x2d0] sm:$0xff] }
  0x81   : > { %447 = vmatpush2.msra.mxu0 %v368_v31  ;;  %524 = vmatpush2.msra.mxu1 %v370_v32  ;;  %v599_v17 = vld [vmem:[%s1425_s5 + $0xc8] sm:$0xff]  ;;  %v598_v19 = vld [vmem:[%s1425_s5 + $0xc0] sm:$0xff]  ;;  %v597_v21 = vld [vmem:[%s1425_s5 + $0xb8] sm:$0xff] }
  0x82   : > { %448 = vmatprep.subr.mxu0 %v365_v33  ;;  %525 = vmatprep.subr.mxu1 %v367_v34  ;;  %v663_v18 = vld [vmem:[%s1425_s5 + $0x2c8] sm:$0xff]  ;;  %v662_v20 = vld [vmem:[%s1425_s5 + $0x2c0] sm:$0xff]  ;;  %v661_v22 = vld [vmem:[%s1425_s5 + $0x2b8] sm:$0xff] }
  0x83   : > { %449 = vmatpush2.msra.mxu0 %v364_v35  ;;  %526 = vmatpush2.msra.mxu1 %v366_v36  ;;  %v596_v23 = vld [vmem:[%s1425_s5 + $0xb0] sm:$0xff]  ;;  %v595_v25 = vld [vmem:[%s1425_s5 + $0xa8] sm:$0xff]  ;;  %v594_v27 = vld [vmem:[%s1425_s5 + $0xa0] sm:$0xff] }
  0x84   : > { %450 = vmatprep.subr.mxu0 %v361_v37  ;;  %527 = vmatprep.subr.mxu1 %v363_v38  ;;  %v660_v24 = vld [vmem:[%s1425_s5 + $0x2b0] sm:$0xff]  ;;  %v659_v26 = vld [vmem:[%s1425_s5 + $0x2a8] sm:$0xff]  ;;  %v658_v28 = vld [vmem:[%s1425_s5 + $0x2a0] sm:$0xff] }
  0x85   : > { %451 = vmatpush2.msra.mxu0 %v360_v39  ;;  %528 = vmatpush2.msra.mxu1 %v362_v40  ;;  %v593_v29 = vld [vmem:[%s1425_s5 + $0x98] sm:$0xff]  ;;  %v592_v31 = vld [vmem:[%s1425_s5 + $0x90] sm:$0xff]  ;;  %v591_v33 = vld [vmem:[%s1425_s5 + $0x88] sm:$0xff] }
  0x86   : > { %452 = vmatprep.subr.mxu0 %v357_v41  ;;  %529 = vmatprep.subr.mxu1 %v359_v42  ;;  %v657_v30 = vld [vmem:[%s1425_s5 + $0x298] sm:$0xff]  ;;  %v656_v32 = vld [vmem:[%s1425_s5 + $0x290] sm:$0xff]  ;;  %v655_v34 = vld [vmem:[%s1425_s5 + $0x288] sm:$0xff] }
  0x87   : > { %453 = vmatpush2.msra.mxu0 %v356_v43  ;;  %530 = vmatpush2.msra.mxu1 %v358_v44  ;;  %v590_v35 = vld [vmem:[%s1425_s5 + $0x80] sm:$0xff]  ;;  %v589_v37 = vld [vmem:[%s1425_s5 + $0x78] sm:$0xff]  ;;  %v588_v39 = vld [vmem:[%s1425_s5 + $0x70] sm:$0xff] }
  0x88   : > { %454 = vmatprep.subr.mxu0 %v353_v45  ;;  %531 = vmatprep.subr.mxu1 %v355_v46  ;;  %v654_v36 = vld [vmem:[%s1425_s5 + $0x280] sm:$0xff]  ;;  %v653_v38 = vld [vmem:[%s1425_s5 + $0x278] sm:$0xff]  ;;  %v652_v40 = vld [vmem:[%s1425_s5 + $0x270] sm:$0xff] }
  0x89   : > { %455 = vmatpush2.msra.mxu0 %v352_v47  ;;  %532 = vmatpush2.msra.mxu1 %v354_v48  ;;  %v587_v41 = vld [vmem:[%s1425_s5 + $0x68] sm:$0xff]  ;;  %v586_v43 = vld [vmem:[%s1425_s5 + $0x60] sm:$0xff]  ;;  %v585_v45 = vld [vmem:[%s1425_s5 + $0x58] sm:$0xff] }
  0x8a   : > { %456 = vmatprep.subr.mxu0 %v349_v49  ;;  %533 = vmatprep.subr.mxu1 %v351_v50  ;;  %v651_v42 = vld [vmem:[%s1425_s5 + $0x268] sm:$0xff]  ;;  %v650_v44 = vld [vmem:[%s1425_s5 + $0x260] sm:$0xff]  ;;  %v649_v46 = vld [vmem:[%s1425_s5 + $0x258] sm:$0xff] }
  0x8b   : > { %457 = vmatpush2.msra.mxu0 %v348_v51  ;;  %534 = vmatpush2.msra.mxu1 %v350_v52  ;;  %v584_v47 = vld [vmem:[%s1425_s5 + $0x50] sm:$0xff]  ;;  %v583_v49 = vld [vmem:[%s1425_s5 + $0x48] sm:$0xff]  ;;  %v582_v51 = vld [vmem:[%s1425_s5 + $0x40] sm:$0xff] }
  0x8c   : > { %458 = vmatprep.subr.mxu0 %v345_v53  ;;  %535 = vmatprep.subr.mxu1 %v347_v54  ;;  %v648_v48 = vld [vmem:[%s1425_s5 + $0x250] sm:$0xff]  ;;  %v647_v50 = vld [vmem:[%s1425_s5 + $0x248] sm:$0xff]  ;;  %v646_v52 = vld [vmem:[%s1425_s5 + $0x240] sm:$0xff] }
  0x8d   : > { %459 = vmatpush2.msra.mxu0 %v344_v55  ;;  %536 = vmatpush2.msra.mxu1 %v346_v56  ;;  %v581_v53 = vld [vmem:[%s1425_s5 + $0x38] sm:$0xff]  ;;  %v580_v55 = vld [vmem:[%s1425_s5 + $0x30] sm:$0xff] }
  0x8e   : > { %460 = vmatprep.subr.mxu0 %v341_v57  ;;  %537 = vmatprep.subr.mxu1 %v343_v58  ;;  %v645_v54 = vld [vmem:[%s1425_s5 + $0x238] sm:$0xff]  ;;  %v644_v56 = vld [vmem:[%s1425_s5 + $0x230] sm:$0xff]  ;;  %v579_v57 = vld [vmem:[%s1425_s5 + $0x28] sm:$0xff] }
  0x8f   : > { %461 = vmatpush2.msra.mxu0 %v340_v59  ;;  %538 = vmatpush2.msra.mxu1 %v342_v60  ;;  %v643_v58 = vld [vmem:[%s1425_s5 + $0x228] sm:$0xff]  ;;  %v578_v59 = vld [vmem:[%s1425_s5 + $0x20] sm:$0xff] }
  0x90   : > { %462 = vmatprep.subr.mxu0 %v337_v61  ;;  %539 = vmatprep.subr.mxu1 %v339_v62  ;;  %v642_v60 = vld [vmem:[%s1425_s5 + $0x220] sm:$0xff]  ;;  %v577_v61 = vld [vmem:[%s1425_s5 + $0x18] sm:$0xff] }
  0x91   : > { %463 = vmatpush2.msra.mxu0 %v336_v63  ;;  %464 = vmatprep.mubr.f32.mxu0 %v269_v0  ;;  %v641_v62 = vld [vmem:[%s1425_s5 + $0x218] sm:$0xff]  ;;  %v576_v63 = vld [vmem:[%s1425_s5 + $0x10] sm:$0xff] }
  0x92   : > { %540 = vmatpush2.msra.mxu1 %v338_v1  ;;  %541 = vmatprep.mubr.f32.mxu1 %v269_v0  ;;  %v640_v0 = vld [vmem:[%s1425_s5 + $0x210] sm:$0xff]  ;;  %v575_v1 = vld [vmem:[%s1425_s5 + $0x8] sm:$0xff] }
  0x93   : > { %465 = vmatmul.mubr.f32.vlgmr.msra.gmra.mxu0 %v268_v2  ;;  %542 = vmatmul.mubr.f32.vlgmr.msra.gmra.mxu1 %v268_v2  ;;  %v639_v2 = vld [vmem:[%s1425_s5 + $0x208] sm:$0xff] }
  0x94   : > { %470 = vmatprep.mubr.f32.mxu0 %v271_v3  ;;  %547 = vmatprep.mubr.f32.mxu1 %v271_v3  ;;  %v574_v3 = vld [vmem:[%s1425_s5] sm:$0xff] }
  0x95   : > { %702 = vmatprep.subr.mxu0 %v605_v4  ;;  %779 = vmatprep.subr.mxu1 %v669_v5  ;;  %v638_v4 = vld [vmem:[%s1425_s5 + $0x200] sm:$0xff]  ;;  %v637_v5 = vld [vmem:[%s1425_s5 + $0x1f8] sm:$0xff] }
  0x96   : > { %703 = vmatpush1.msra.mxu0 %v604_v6  ;;  %780 = vmatpush1.msra.mxu1 %v668_v7  ;;  %v701_v6 = vld [vmem:[%s1425_s5 + $0x3f8] sm:$0xff]  ;;  %v636_v7 = vld [vmem:[%s1425_s5 + $0x1f0] sm:$0xff] }
  0x97   : > { %471 = vmatmul.mubr.f32.gmra.mxu0 %v270_v8  ;;  %548 = vmatmul.mubr.f32.gmra.mxu1 %v270_v8  ;;  %v700_v8 = vld [vmem:[%s1425_s5 + $0x3f0] sm:$0xff] }
  0x98   : > { %704 = vmatprep.subr.mxu0 %v603_v9  ;;  %781 = vmatprep.subr.mxu1 %v667_v10  ;;  %v635_v9 = vld [vmem:[%s1425_s5 + $0x1e8] sm:$0xff] }
  0x99   : > { %705 = vmatpush1.msra.mxu0 %v602_v11  ;;  %782 = vmatpush1.msra.mxu1 %v666_v12  ;;  %v699_v10 = vld [vmem:[%s1425_s5 + $0x3e8] sm:$0xff]  ;;  %v634_v11 = vld [vmem:[%s1425_s5 + $0x1e0] sm:$0xff] }
  0x9a   : > { %706 = vmatprep.subr.mxu0 %v601_v13  ;;  %783 = vmatprep.subr.mxu1 %v665_v14  ;;  %v698_v12 = vld [vmem:[%s1425_s5 + $0x3e0] sm:$0xff]  ;;  %v633_v13 = vld [vmem:[%s1425_s5 + $0x1d8] sm:$0xff] }
  0x9b   : > { %707 = vmatpush1.msra.mxu0 %v600_v15  ;;  %784 = vmatpush1.msra.mxu1 %v664_v16  ;;  %v697_v14 = vld [vmem:[%s1425_s5 + $0x3d8] sm:$0xff]  ;;  %v632_v15 = vld [vmem:[%s1425_s5 + $0x1d0] sm:$0xff] }
  0x9c   : > { %708 = vmatprep.subr.mxu0 %v599_v17  ;;  %785 = vmatprep.subr.mxu1 %v663_v18  ;;  %v696_v16 = vld [vmem:[%s1425_s5 + $0x3d0] sm:$0xff]  ;;  %v631_v17 = vld [vmem:[%s1425_s5 + $0x1c8] sm:$0xff] }
  0x9d   : > { %709 = vmatpush1.msra.mxu0 %v598_v19  ;;  %786 = vmatpush1.msra.mxu1 %v662_v20  ;;  %v695_v18 = vld [vmem:[%s1425_s5 + $0x3c8] sm:$0xff]  ;;  %v630_v19 = vld [vmem:[%s1425_s5 + $0x1c0] sm:$0xff] }
  0x9e   : > { %710 = vmatprep.subr.mxu0 %v597_v21  ;;  %787 = vmatprep.subr.mxu1 %v661_v22  ;;  %v694_v20 = vld [vmem:[%s1425_s5 + $0x3c0] sm:$0xff]  ;;  %v629_v21 = vld [vmem:[%s1425_s5 + $0x1b8] sm:$0xff] }
  0x9f   : > { %711 = vmatpush1.msra.mxu0 %v596_v23  ;;  %788 = vmatpush1.msra.mxu1 %v660_v24  ;;  %v693_v22 = vld [vmem:[%s1425_s5 + $0x3b8] sm:$0xff]  ;;  %v628_v23 = vld [vmem:[%s1425_s5 + $0x1b0] sm:$0xff] }
  0xa0   : > { %712 = vmatprep.subr.mxu0 %v595_v25  ;;  %789 = vmatprep.subr.mxu1 %v659_v26  ;;  %v692_v24 = vld [vmem:[%s1425_s5 + $0x3b0] sm:$0xff]  ;;  %v627_v25 = vld [vmem:[%s1425_s5 + $0x1a8] sm:$0xff] }
  0xa1   : > { %713 = vmatpush1.msra.mxu0 %v594_v27  ;;  %790 = vmatpush1.msra.mxu1 %v658_v28  ;;  %v691_v26 = vld [vmem:[%s1425_s5 + $0x3a8] sm:$0xff]  ;;  %v626_v27 = vld [vmem:[%s1425_s5 + $0x1a0] sm:$0xff] }
  0xa2   : > { %714 = vmatprep.subr.mxu0 %v593_v29  ;;  %791 = vmatprep.subr.mxu1 %v657_v30  ;;  %v690_v28 = vld [vmem:[%s1425_s5 + $0x3a0] sm:$0xff]  ;;  %v625_v29 = vld [vmem:[%s1425_s5 + $0x198] sm:$0xff] }
  0xa3   : > { %715 = vmatpush1.msra.mxu0 %v592_v31  ;;  %792 = vmatpush1.msra.mxu1 %v656_v32  ;;  %v689_v30 = vld [vmem:[%s1425_s5 + $0x398] sm:$0xff]  ;;  %v624_v31 = vld [vmem:[%s1425_s5 + $0x190] sm:$0xff] }
  0xa4   : > { %716 = vmatprep.subr.mxu0 %v591_v33  ;;  %793 = vmatprep.subr.mxu1 %v655_v34  ;;  %v688_v32 = vld [vmem:[%s1425_s5 + $0x390] sm:$0xff]  ;;  %v623_v33 = vld [vmem:[%s1425_s5 + $0x188] sm:$0xff] }
  0xa5   : > { %717 = vmatpush1.msra.mxu0 %v590_v35  ;;  %794 = vmatpush1.msra.mxu1 %v654_v36  ;;  %v687_v34 = vld [vmem:[%s1425_s5 + $0x388] sm:$0xff]  ;;  %v622_v35 = vld [vmem:[%s1425_s5 + $0x180] sm:$0xff] }
  0xa6   : > { %718 = vmatprep.subr.mxu0 %v589_v37  ;;  %795 = vmatprep.subr.mxu1 %v653_v38  ;;  %v686_v36 = vld [vmem:[%s1425_s5 + $0x380] sm:$0xff]  ;;  %v621_v37 = vld [vmem:[%s1425_s5 + $0x178] sm:$0xff] }
  0xa7   : > { %719 = vmatpush1.msra.mxu0 %v588_v39  ;;  %796 = vmatpush1.msra.mxu1 %v652_v40  ;;  %v685_v38 = vld [vmem:[%s1425_s5 + $0x378] sm:$0xff]  ;;  %v620_v39 = vld [vmem:[%s1425_s5 + $0x170] sm:$0xff] }
  0xa8   : > { %720 = vmatprep.subr.mxu0 %v587_v41  ;;  %797 = vmatprep.subr.mxu1 %v651_v42  ;;  %v684_v40 = vld [vmem:[%s1425_s5 + $0x370] sm:$0xff]  ;;  %v619_v41 = vld [vmem:[%s1425_s5 + $0x168] sm:$0xff] }
  0xa9   : > { %721 = vmatpush1.msra.mxu0 %v586_v43  ;;  %798 = vmatpush1.msra.mxu1 %v650_v44  ;;  %v683_v42 = vld [vmem:[%s1425_s5 + $0x368] sm:$0xff]  ;;  %v618_v43 = vld [vmem:[%s1425_s5 + $0x160] sm:$0xff] }
  0xaa   : > { %722 = vmatprep.subr.mxu0 %v585_v45  ;;  %799 = vmatprep.subr.mxu1 %v649_v46  ;;  %v682_v44 = vld [vmem:[%s1425_s5 + $0x360] sm:$0xff]  ;;  %v617_v45 = vld [vmem:[%s1425_s5 + $0x158] sm:$0xff] }
  0xab   : > { %723 = vmatpush1.msra.mxu0 %v584_v47  ;;  %800 = vmatpush1.msra.mxu1 %v648_v48  ;;  %v681_v46 = vld [vmem:[%s1425_s5 + $0x358] sm:$0xff]  ;;  %v616_v47 = vld [vmem:[%s1425_s5 + $0x150] sm:$0xff] }
  0xac   : > { %724 = vmatprep.subr.mxu0 %v583_v49  ;;  %801 = vmatprep.subr.mxu1 %v647_v50  ;;  %v680_v48 = vld [vmem:[%s1425_s5 + $0x350] sm:$0xff]  ;;  %v615_v49 = vld [vmem:[%s1425_s5 + $0x148] sm:$0xff] }
  0xad   : > { %725 = vmatpush1.msra.mxu0 %v582_v51  ;;  %802 = vmatpush1.msra.mxu1 %v646_v52  ;;  %v679_v50 = vld [vmem:[%s1425_s5 + $0x348] sm:$0xff]  ;;  %v614_v51 = vld [vmem:[%s1425_s5 + $0x140] sm:$0xff] }
  0xae   : > { %726 = vmatprep.subr.mxu0 %v581_v53  ;;  %803 = vmatprep.subr.mxu1 %v645_v54  ;;  %v678_v52 = vld [vmem:[%s1425_s5 + $0x340] sm:$0xff]  ;;  %v613_v53 = vld [vmem:[%s1425_s5 + $0x138] sm:$0xff] }
  0xaf   : > { %727 = vmatpush1.msra.mxu0 %v580_v55  ;;  %804 = vmatpush1.msra.mxu1 %v644_v56  ;;  %v677_v54 = vld [vmem:[%s1425_s5 + $0x338] sm:$0xff]  ;;  %v612_v55 = vld [vmem:[%s1425_s5 + $0x130] sm:$0xff] }
  0xb0   : > { %728 = vmatprep.subr.mxu0 %v579_v57  ;;  %805 = vmatprep.subr.mxu1 %v643_v58  ;;  %v676_v56 = vld [vmem:[%s1425_s5 + $0x330] sm:$0xff]  ;;  %v611_v57 = vld [vmem:[%s1425_s5 + $0x128] sm:$0xff] }
  0xb1   : > { %729 = vmatpush1.msra.mxu0 %v578_v59  ;;  %806 = vmatpush1.msra.mxu1 %v642_v60  ;;  %v675_v58 = vld [vmem:[%s1425_s5 + $0x328] sm:$0xff]  ;;  %v610_v59 = vld [vmem:[%s1425_s5 + $0x120] sm:$0xff] }
  0xb2   : > { %730 = vmatprep.subr.mxu0 %v577_v61  ;;  %807 = vmatprep.subr.mxu1 %v641_v62  ;;  %v674_v60 = vld [vmem:[%s1425_s5 + $0x320] sm:$0xff]  ;;  %v609_v61 = vld [vmem:[%s1425_s5 + $0x118] sm:$0xff] }
  0xb3   : > { %731 = vmatpush1.msra.mxu0 %v576_v63  ;;  %808 = vmatpush1.msra.mxu1 %v640_v0  ;;  %v673_v62 = vld [vmem:[%s1425_s5 + $0x318] sm:$0xff]  ;;  %v608_v63 = vld [vmem:[%s1425_s5 + $0x110] sm:$0xff] }
  0xb4   : > { %732 = vmatprep.subr.mxu0 %v575_v1  ;;  %809 = vmatprep.subr.mxu1 %v639_v2  ;;  %v672_v0 = vld [vmem:[%s1425_s5 + $0x310] sm:$0xff]  ;;  %v607_v1 = vld [vmem:[%s1425_s5 + $0x108] sm:$0xff] }
  0xb5   : > { %733 = vmatpush1.msra.mxu0 %v574_v3  ;;  %810 = vmatpush1.msra.mxu1 %v638_v4  ;;  %v671_v2 = vld [vmem:[%s1425_s5 + $0x308] sm:$0xff]  ;;  %v606_v3 = vld [vmem:[%s1425_s5 + $0x100] sm:$0xff] }
  0xb6   : > { %734 = vmatprep.subr.mxu0 %v637_v5  ;;  %811 = vmatprep.subr.mxu1 %v701_v6  ;;  %v670_v4 = vld [vmem:[%s1425_s5 + $0x300] sm:$0xff] }
  0xb7   : > { %735 = vmatpush2.msra.mxu0 %v636_v7  ;;  %812 = vmatpush2.msra.mxu1 %v700_v8 }
  0xb8   : > { %736 = vmatprep.subr.mxu0 %v635_v9  ;;  %813 = vmatprep.subr.mxu1 %v699_v10 }
  0xb9   : > { %737 = vmatpush2.msra.mxu0 %v634_v11  ;;  %814 = vmatpush2.msra.mxu1 %v698_v12 }
  0xba   : > { %738 = vmatprep.subr.mxu0 %v633_v13  ;;  %815 = vmatprep.subr.mxu1 %v697_v14 }
  0xbb   : > { %739 = vmatpush2.msra.mxu0 %v632_v15  ;;  %816 = vmatpush2.msra.mxu1 %v696_v16 }
  0xbc   : > { %740 = vmatprep.subr.mxu0 %v631_v17  ;;  %817 = vmatprep.subr.mxu1 %v695_v18 }
  0xbd   : > { %741 = vmatpush2.msra.mxu0 %v630_v19  ;;  %818 = vmatpush2.msra.mxu1 %v694_v20 }
  0xbe   : > { %742 = vmatprep.subr.mxu0 %v629_v21  ;;  %819 = vmatprep.subr.mxu1 %v693_v22 }
  0xbf   : > { %743 = vmatpush2.msra.mxu0 %v628_v23  ;;  %820 = vmatpush2.msra.mxu1 %v692_v24 }
  0xc0   : > { %744 = vmatprep.subr.mxu0 %v627_v25  ;;  %821 = vmatprep.subr.mxu1 %v691_v26 }
  0xc1   : > { %745 = vmatpush2.msra.mxu0 %v626_v27  ;;  %822 = vmatpush2.msra.mxu1 %v690_v28 }
  0xc2   : > { %746 = vmatprep.subr.mxu0 %v625_v29  ;;  %823 = vmatprep.subr.mxu1 %v689_v30  ;;  %v570_v30 = vld [vmem:[#allocation2 + $0x10] sm:$0xff] }
  0xc3   : > { %747 = vmatpush2.msra.mxu0 %v624_v31  ;;  %824 = vmatpush2.msra.mxu1 %v688_v32 }
  0xc4   : > { %748 = vmatprep.subr.mxu0 %v623_v33  ;;  %825 = vmatprep.subr.mxu1 %v687_v34  ;;  %v571_v34 = vld [vmem:[#allocation2] sm:$0xff] }
  0xc5   : > { %749 = vmatpush2.msra.mxu0 %v622_v35  ;;  %826 = vmatpush2.msra.mxu1 %v686_v36 }
  0xc6   : > { %750 = vmatprep.subr.mxu0 %v621_v37  ;;  %827 = vmatprep.subr.mxu1 %v685_v38 }
  0xc7   : > { %751 = vmatpush2.msra.mxu0 %v620_v39  ;;  %828 = vmatpush2.msra.mxu1 %v684_v40  ;;  %v572_v39 = vld [vmem:[#allocation2 + $0x18] sm:$0xff] }
  0xc8   : > { %752 = vmatprep.subr.mxu0 %v619_v41  ;;  %829 = vmatprep.subr.mxu1 %v683_v42 }
  0xc9   : > { %753 = vmatpush2.msra.mxu0 %v618_v43  ;;  %830 = vmatpush2.msra.mxu1 %v682_v44  ;;  %v573_v44 = vld [vmem:[#allocation2 + $0x8] sm:$0xff] }
  0xca   : > { %754 = vmatprep.subr.mxu0 %v617_v45  ;;  %831 = vmatprep.subr.mxu1 %v681_v46 }
  0xcb   : > { %755 = vmatpush2.msra.mxu0 %v616_v47  ;;  %832 = vmatpush2.msra.mxu1 %v680_v48 }
  0xcc   : > { %756 = vmatprep.subr.mxu0 %v615_v49  ;;  %833 = vmatprep.subr.mxu1 %v679_v50 }
  0xcd   : > { %757 = vmatpush2.msra.mxu0 %v614_v51  ;;  %834 = vmatpush2.msra.mxu1 %v678_v52 }
  0xce   : > { %758 = vmatprep.subr.mxu0 %v613_v53  ;;  %835 = vmatprep.subr.mxu1 %v677_v54 }
  0xcf   : > { %759 = vmatpush2.msra.mxu0 %v612_v55  ;;  %836 = vmatpush2.msra.mxu1 %v676_v56 }
  0xd0   : > { %760 = vmatprep.subr.mxu0 %v611_v57  ;;  %837 = vmatprep.subr.mxu1 %v675_v58 }
  0xd1   : > { %761 = vmatpush2.msra.mxu0 %v610_v59  ;;  %838 = vmatpush2.msra.mxu1 %v674_v60 }
  0xd2   : > { %762 = vmatprep.subr.mxu0 %v609_v61  ;;  %839 = vmatprep.subr.mxu1 %v673_v62 }
  0xd3   : > { %763 = vmatpush2.msra.mxu0 %v608_v63  ;;  %840 = vmatpush2.msra.mxu1 %v672_v0 }
  0xd4   : > { %764 = vmatprep.subr.mxu0 %v607_v1  ;;  %841 = vmatprep.subr.mxu1 %v671_v2 }
  0xd5   : > { %765 = vmatpush2.msra.mxu0 %v606_v3  ;;  %842 = vmatpush2.msra.mxu1 %v670_v4 }
 0x153   : > { %v466_v5 = vpop.f32.mrf.mxu0  ;;  %v543_v6 = vpop.f32.mrf.mxu1 }
 0x154   : > { %v554_v7 = vmax.f32 %v466_v5, 0.0  ;;  %v556_v8 = vmax.f32 %v543_v6, 0.0 }
 0x155   : > { %v468_v9 = vpop.f32.mrf.mxu0  ;;  %v545_v10 = vpop.f32.mrf.mxu1 }
 0x156   : > { %v555_v11 = vmax.f32 %v468_v9, 0.0  ;;  %v557_v12 = vmax.f32 %v545_v10, 0.0  ;;  %v562_v17 = vmul.f32 %v554_v7, %v554_v7  ;;  %v564_v18 = vmul.f32 %v556_v8, %v556_v8 }
 0x157   : > { %v472_v13 = vpop.f32.mrf.mxu0  ;;  %v549_v14 = vpop.f32.mrf.mxu1 }
 0x158   : > { %v563_v15 = vmul.f32 %v555_v11, %v555_v11  ;;  %v565_v16 = vmul.f32 %v557_v12, %v557_v12  ;;  %v558_v19 = vmax.f32 %v472_v13, 0.0  ;;  %v560_v20 = vmax.f32 %v549_v14, 0.0 }
 0x159   : > { %v474_v21 = vpop.f32.mrf.mxu0  ;;  %v551_v22 = vpop.f32.mrf.mxu1 }
 0x15a   : > { %v559_v23 = vmax.f32 %v474_v21, 0.0  ;;  %v561_v24 = vmax.f32 %v551_v22, 0.0  ;;  %766 = vmatprep.mubr.f32.mxu0 %v563_v15  ;;  %843 = vmatprep.mubr.f32.mxu1 %v565_v16  ;;  %v566_v27 = vmul.f32 %v558_v19, %v558_v19  ;;  %v568_v28 = vmul.f32 %v560_v20, %v560_v20 }
 0x15b   : > { %767 = vmatmul.mubr.f32.vlgmr.msra.gmra.mxu0 %v562_v17  ;;  %844 = vmatmul.mubr.f32.vlgmr.msra.gmra.mxu1 %v564_v18 }
 0x15c   : > { %v567_v25 = vmul.f32 %v559_v23, %v559_v23  ;;  %v569_v26 = vmul.f32 %v561_v24, %v561_v24 }
 0x15e   : > { %772 = vmatprep.mubr.f32.mxu0 %v567_v25  ;;  %849 = vmatprep.mubr.f32.mxu1 %v569_v26 }
 0x15f   : > { %773 = vmatmul.mubr.f32.gmra.mxu0 %v566_v27  ;;  %850 = vmatmul.mubr.f32.gmra.mxu1 %v568_v28 }
 0x21b   : > { %v768_v29 = vpop.f32.mrf.mxu0  ;;  %v845_v31 = vpop.f32.mrf.mxu1 }
 0x21c   : > { %v846_v32 = vadd.f32 %v845_v31, %v768_v29 }
 0x21d   : > { %v770_v33 = vpop.f32.mrf.mxu0  ;;  %v847_v35 = vpop.f32.mrf.mxu1 }
 0x21e   : > { %v856_v36 = vadd.f32 %v846_v32, %v570_v30  ;;  %v848_v37 = vadd.f32 %v847_v35, %v770_v33 }
 0x21f   : > { %v774_v38 = vpop.f32.mrf.mxu0  ;;  %v851_v40 = vpop.f32.mrf.mxu1 }
 0x220   : > { %860 = vst [vmem:[#allocation2 + $0x10] sm:$0xff] %v856_v36  ;;  %v857_v41 = vadd.f32 %v848_v37, %v571_v34  ;;  %v852_v42 = vadd.f32 %v851_v40, %v774_v38 }
 0x221   : > { %v776_v43 = vpop.f32.mrf.mxu0  ;;  %v853_v45 = vpop.f32.mrf.mxu1 }
 0x222   : > { %861 = vst [vmem:[#allocation2] sm:$0xff] %v857_v41  ;;  %v858_v46 = vadd.f32 %v852_v42, %v572_v39  ;;  %v854_v47 = vadd.f32 %v853_v45, %v776_v43  ;;  %867 = sbr.rel (%p1000_p7) target bundleno = 559 (0x22f), region = 52 }
 0x224   : > { %862 = vst [vmem:[#allocation2 + $0x18] sm:$0xff] %v858_v46  ;;  %v859_v48 = vadd.f32 %v854_v47, %v573_v44 }
 0x226   : > { %863 = vst [vmem:[#allocation2 + $0x8] sm:$0xff] %v859_v48 }
 0x227   : > { %v868_v49 = vld [vmem:[#allocation2 + $0x10] sm:$0xff] }
 0x228   : > { %872 = vst [vmem:[#allocation9] sm:$0xff] %v868_v49 }
 0x229   : > { %v869_v50 = vld [vmem:[#allocation2] sm:$0xff] }
 0x22a   : > { %873 = vst [vmem:[#allocation9 + $0x8] sm:$0xff] %v869_v50 }
 0x22b   : > { %v870_v51 = vld [vmem:[#allocation2 + $0x18] sm:$0xff] }
 0x22c   : > { %874 = vst [vmem:[#allocation9 + $0x10] sm:$0xff] %v870_v51 }
 0x22d   : > { %v871_v52 = vld [vmem:[#allocation2 + $0x8] sm:$0xff] }
 0x22e   : > { %875 = vst [vmem:[#allocation9 + $0x18] sm:$0xff] %v871_v52 }
 0x22f PF: > { %p1034_p2 = scmp.eq.s32.totalorder %s1359_s20, 1  ;;  %s1269_s21 = smov [#allocation9]  }
 0x230   : > { %s886_s22 = sshll.u32 %s1269_s21, 4  ;;  %s887_s22 = int_to_ptr.vmem [resolvable:$true] %s886_s22 }
 0x231   : > { %s1176_s4 = scalar_lea.vmem %s887_s22, 512  ;;  %p1183_p9 = scmp.lt.s32.totalorder %s887_s22, %s887_s22 }
 0x232   : > { %p1177_p5 = scmp.ne.s32.totalorder %s887_s22, %s1176_s4  ;;  %p1184_p11 = scmp.lt.s32.totalorder %s1176_s4, %s1176_s4 }
 0x234   : > { %p1178_p8 = pnand %p1177_p5, %p1034_p2  ;;  %p1185_p12 = por %p1184_p11, %p1183_p9 }
 0x236   : > { %p1179_p10 = pneg %p1178_p8 }
 0x238   : > { %p1186_p13 = pnand %p1185_p12, %p1179_p10 }
 0x23a   : > { %1189 = shalt.err (!%p1186_p13)
}
 0x23b   : > { %s1270_s15 = smov 256   ;;  %s1271_s7 = smov 16  }
 0x23c   : > { %1017 = dma.vmem_to_hbm [thread:$0]  (%p1034_p2), %s887_s22, 512, %s1718_s3, [#allocation5], %s1270_s15, %s1270_s15, %s1271_s7  }
 0x23d   : > { %1233 = dma.done.wait (%p1034_p2), [#allocation5], 512  }
 0x23e   : > { %1235 = vsyncadd (%p1034_p2), [#allocation5], 4294966784 }
 0x23f PF: > { %s18_s17 = sadd.s32 1, %s1258_s17   ;;  %s1723_s12 = smov %s1242_s13 }
 0x240   : > { %p15_p0 = scmp.ge.s32.totalorder %s18_s17, 4   ;;  %s1724_s13 = smov %s1246_s14 }
 0x241   : > { %s1725_s14 = smov %s1336_s24  ;;  %s1726_s15 = smov %s1254_s16 }
 0x242   : > { %s1727_s16 = smov %s1729_s18  ;;  %17 = sbr.rel (!%p15_p0) target bundleno = 6 (0x6), region = 95 }
 0x247   :  { %902 = vsyncpa [#allocation4], 1 }
 0x248   :  { %904 = vsyncpa [#allocation4 + $0x1], 1 }
 0x249   :  { %905 = vsyncpa [#allocation7], 1 }
 0x24a   :  { %907 = vsyncpa [#allocation7 + $0x1], 1 }
 0x24b   :  { %908 = vsyncpa [#allocation5], 1 }
 0x24c   :  { %910 = vsyncpa [#allocation5 + $0x1], 1 }

</bundles_post_ra>
